<compile_context>
chip_gen: v7x
topology: tpu7x:2x2x1
jax: 0.10.0
libtpu: 0.0.40
codegen_flags: <defaults>
</compile_context>

<pallas_src>
import functools

import jax
import jax.numpy as jnp
from jax import lax
from jax.experimental import pallas as pl
from jax.experimental.pallas import tpu as pltpu


def _round_up(x: int, m: int) -> int:
    return ((x + m - 1) // m) * m


def _resident_spec(shape):
    """BlockSpec for a grid-invariant (weight/bias) operand.

    The index_map is constant across the grid, so the block only ever needs a
    single VMEM buffer; pl.Buffered(1) halves its footprint vs. the default
    double-buffering.  Falls back if this BlockSpec has no pipeline_mode field.
    """
    index_map = lambda i: (0,) * len(shape)
    try:
        return pl.BlockSpec(shape, index_map, pipeline_mode=pl.Buffered(1))
    except TypeError:  # older BlockSpec without pipeline_mode
        return pl.BlockSpec(shape, index_map)


def _ffn_kernel(x_ref, w1_ref, b1_ref, w2_ref, b2_ref, o_ref):
    # x_ref:  (tm, H) in the I/O dtype.
    # w*_ref: (H, H) bf16, PyTorch nn.Linear layout (out_features, in_features).
    # b*_ref: (1, H) f32.
    x = x_ref[...].astype(jnp.bfloat16)

    # x @ w1.T : contract x's last dim with w1's last dim (transposed RHS is
    # MXU-native, so no wrapper-side transpose is needed).  f32 accumulation.
    h = lax.dot_general(
        x, w1_ref[...],
        dimension_numbers=(((1,), (1,)), ((), ())),
        preferred_element_type=jnp.float32)
    h = h + b1_ref[...]              # f32 bias add (VPU; v5e has no bf16 VPU)
    h = h * jax.nn.sigmoid(h)        # SiLU in f32 (sigmoid -> EUP slot)

    # Second matmul: bf16 operands, f32 accumulation.
    y = lax.dot_general(
        h.astype(jnp.bfloat16), w2_ref[...],
        dimension_numbers=(((1,), (1,)), ((), ())),
        preferred_element_type=jnp.float32)
    y = y + b2_ref[...]

    o_ref[...] = y.astype(o_ref.dtype)


@functools.partial(jax.jit, static_argnames=("block_m",))
def ffn_forward(x, w1, b1, w2, b2, *, block_m: int = 512):
    """y = SiLU(x @ w1.T + b1) @ w2.T + b2   (PyTorch FFN forward).

    x: (..., H).  w1, w2: (H, H) in PyTorch nn.Linear layout
    (out_features, in_features).  b1, b2: (H,).
    """
    H = x.shape[-1]
    orig_shape = x.shape
    x2 = x.reshape(-1, H)
    M = x2.shape[0]

    # Sublane packing of the I/O dtype: 8 rows for 4-byte, 16 for 2-byte, ...
    sub = {4: 8, 2: 16, 1: 32}.get(jnp.dtype(x2.dtype).itemsize, 8)

    # Only pad when M is smaller than one sublane tile (a few rows); otherwise
    # Pallas handles the ragged last row block, no full-array HBM pad needed.
    if M < sub:
        x2 = jnp.pad(x2, ((0, sub - M), (0, 0)))
    Mp = x2.shape[0]

    tm = min(block_m, _round_up(Mp, sub))
    # Keep the "parallel" row axis >= 2 grid steps when rows allow it so both
    # v7x TensorCores get work (and the pipeline has something to overlap).
    if Mp > sub and pl.cdiv(Mp, tm) < 2:
        tm = _round_up(pl.cdiv(Mp, 2), sub)
    grid_m = pl.cdiv(Mp, tm)

    # Weights cast to bf16 once here (not per grid step inside the kernel) and
    # kept in the PyTorch (out, in) layout -- no transpose pass through HBM.
    w1_c = w1.astype(jnp.bfloat16)
    w2_c = w2.astype(jnp.bfloat16)
    b1_2d = b1.reshape(1, H).astype(jnp.float32)
    b2_2d = b2.reshape(1, H).astype(jnp.float32)

    io_bytes = jnp.dtype(x2.dtype).itemsize
    # VMEM budget: single-buffered bf16 weights + biases, double-buffered x and
    # out tiles, plus f32 intermediates; clamp to the v7x 64 MiB physical VMEM.
    vmem_needed = (2 * H * H * 2 + 2 * H * 4
                   + 2 * tm * H * io_bytes      # x tiles (double-buffered)
                   + 2 * tm * H * io_bytes      # out tiles (double-buffered)
                   + 4 * tm * H * 4)            # f32 intermediates headroom
    vmem_limit = int(min(max(2 * vmem_needed, 32 * 1024 * 1024),
                         64 * 1024 * 1024))

    cost = pl.CostEstimate(
        flops=4 * Mp * H * H,                    # two (Mp,H) x (H,H) matmuls
        transcendentals=Mp * H,                  # one sigmoid per element
        bytes_accessed=(2 * Mp * H * io_bytes    # read x + write out
                        + 2 * H * H * 2          # bf16 weights
                        + 2 * H * 4))            # biases

    # TODO(synk): for H large enough that the two (H, H) bf16 weights blow the
    # VMEM budget (~2.8k+ on v7x), add a K/N reduction grid axis with an f32
    # accumulator instead of keeping the weights fully resident.
    out = pl.pallas_call(
        _ffn_kernel,
        out_shape=jax.ShapeDtypeStruct((Mp, H), x.dtype),
        grid=(grid_m,),
        in_specs=[
            pl.BlockSpec((tm, H), lambda i: (i, 0)),   # x row tile (pipelined)
            _resident_spec((H, H)),                    # w1 (VMEM-resident)
            _resident_spec((1, H)),                    # b1
            _resident_spec((H, H)),                    # w2
            _resident_spec((1, H)),                    # b2
        ],
        out_specs=pl.BlockSpec((tm, H), lambda i: (i, 0)),
        compiler_params=pltpu.CompilerParams(
            dimension_semantics=("parallel",),         # megacore row sharding
            vmem_limit_bytes=vmem_limit),
        cost_estimate=cost,
    )(x2, w1_c, b1_2d, w2_c, b2_2d)

    if Mp != M:
        out = out[:M]
    return out.reshape(orig_shape)


def _ffn_ref(x, w1, b1, w2, b2):
    xf = x.astype(jnp.float32)
    h = xf @ w1.astype(jnp.float32).T + b1.astype(jnp.float32)
    h = h * jax.nn.sigmoid(h)
    y = h @ w2.astype(jnp.float32).T + b2.astype(jnp.float32)
    return y.astype(x.dtype)


if __name__ == "__main__":
    hidden = 128          # hidden_size implied by the module (lane-dense on TPU)
    batch, seq = 2, 8

    key = jax.random.PRNGKey(0)
    k1, k2, k3, k4, k5, k6 = jax.random.split(key, 6)

    x = jax.random.normal(k1, (batch, seq, hidden), dtype=jnp.float32)
    # PyTorch nn.Linear init range / layout: W is (out_features, in_features).
    bound = 1.0 / (hidden ** 0.5)
    w1 = jax.random.uniform(k2, (hidden, hidden), minval=-bound, maxval=bound,
                            dtype=jnp.float32)
    b1 = jax.random.uniform(k3, (hidden,), minval=-bound, maxval=bound,
                            dtype=jnp.float32)
    w2 = jax.random.uniform(k4, (hidden, hidden), minval=-bound, maxval=bound,
                            dtype=jnp.float32)
    b2 = jax.random.uniform(k5, (hidden,), minval=-bound, maxval=bound,
                            dtype=jnp.float32)

    # f32 I/O, multi-step row grid (M = 16 -> tm = 8, grid = (2,)).
    out = ffn_forward(x, w1, b1, w2, b2)
    jax.block_until_ready(out)
    ref = _ffn_ref(x, w1, b1, w2, b2)
    assert out.shape == ref.shape
    # bf16 MXU operands with f32 accumulation -> loosened tolerance vs f32 ref.
    err = float(jnp.max(jnp.abs(out - ref)))
    assert jnp.allclose(out, ref, atol=3e-2, rtol=3e-2), err

    # Ragged row count: M = 13 not a multiple of tm -> ragged last block,
    # handled by Pallas without a full-array pad.
    x_odd = jax.random.normal(k6, (13, hidden), dtype=jnp.float32)
    out_odd = ffn_forward(x_odd, w1, b1, w2, b2)
    jax.block_until_ready(out_odd)
    ref_odd = _ffn_ref(x_odd, w1, b1, w2, b2)
    assert jnp.allclose(out_odd, ref_odd, atol=3e-2, rtol=3e-2)

    # bf16 I/O: dtype-aware sublane rounding (16) + tiny-M pad path.
    x_bf = x_odd.astype(jnp.bfloat16)
    out_bf = ffn_forward(x_bf, w1, b1, w2, b2)
    jax.block_until_ready(out_bf)
    ref_bf = _ffn_ref(x_bf, w1, b1, w2, b2)
    assert out_bf.dtype == jnp.bfloat16
    assert jnp.allclose(out_bf.astype(jnp.float32), ref_bf.astype(jnp.float32),
                        atol=6e-2, rtol=6e-2)

    print("KERNEL_OK")
</pallas_src>

<mosaic_0001>
module attributes {stable_mosaic.version = 11 : i64} {
  func.func @_ffn_kernel(%arg0: i32, %arg1: memref<8x128xf32, #tpu.memory_space<vmem>>, %arg2: memref<128x128xbf16, #tpu.memory_space<vmem>>, %arg3: memref<1x128xf32, #tpu.memory_space<vmem>>, %arg4: memref<128x128xbf16, #tpu.memory_space<vmem>>, %arg5: memref<1x128xf32, #tpu.memory_space<vmem>>, %arg6: memref<8x128xf32, #tpu.memory_space<vmem>>) attributes {dimension_semantics = [#tpu.dimension_semantics<parallel>], iteration_bounds = array<i64: 2>, scalar_prefetch = 0 : i64, scratch_operands = 0 : i64, tpu.core_type = #tpu.core_type<tc>, window_params = [{transform_indices = @transform_0, window_bounds = array<i64: 8, 128>}, {pipeline_mode = #tpu.pipeline_mode<synchronous>, transform_indices = @transform_1, window_bounds = array<i64: 128, 128>}, {pipeline_mode = #tpu.pipeline_mode<synchronous>, transform_indices = @transform_2, window_bounds = array<i64: 1, 128>}, {pipeline_mode = #tpu.pipeline_mode<synchronous>, transform_indices = @transform_3, window_bounds = array<i64: 128, 128>}, {pipeline_mode = #tpu.pipeline_mode<synchronous>, transform_indices = @transform_4, window_bounds = array<i64: 1, 128>}, {transform_indices = @transform_5, window_bounds = array<i64: 8, 128>}]} {
    %c0 = arith.constant 0 : index
    %c0_0 = arith.constant 0 : index
    %0 = vector.load %arg1[%c0, %c0_0] : memref<8x128xf32, #tpu.memory_space<vmem>>, vector<8x128xf32>
    %1 = arith.truncf %0 : vector<8x128xf32> to vector<8x128xbf16>
    %c0_1 = arith.constant 0 : index
    %c0_2 = arith.constant 0 : index
    %2 = vector.load %arg2[%c0_1, %c0_2] : memref<128x128xbf16, #tpu.memory_space<vmem>>, vector<128x128xbf16>
    %cst = arith.constant dense<0.000000e+00> : vector<8x128xf32>
    %3 = tpu.matmul %1, %2, %cst {dimension_numbers = #tpu.dot_dimension_numbers<[1], [1], [0], [0], [0, 0, 1, 0], [], []>} : vector<8x128xbf16>, vector<128x128xbf16>, vector<8x128xf32> -> vector<8x128xf32>
    %c0_3 = arith.constant 0 : index
    %c0_4 = arith.constant 0 : index
    %4 = vector.load %arg3[%c0_3, %c0_4] : memref<1x128xf32, #tpu.memory_space<vmem>>, vector<1x128xf32>
    %5 = vector.broadcast %4 : vector<1x128xf32> to vector<8x128xf32>
    %6 = arith.addf %3, %5 : vector<8x128xf32>
    %7 = arith.negf %6 : vector<8x128xf32>
    %8 = math.exp %7 : vector<8x128xf32>
    %cst_5 = arith.constant 1.000000e+00 : f32
    %9 = vector.broadcast %cst_5 : f32 to vector<8x128xf32>
    %10 = arith.addf %9, %8 : vector<8x128xf32>
    %11 = arith.divf %9, %10 : vector<8x128xf32>
    %12 = arith.mulf %6, %11 : vector<8x128xf32>
    %13 = arith.truncf %12 : vector<8x128xf32> to vector<8x128xbf16>
    %c0_6 = arith.constant 0 : index
    %c0_7 = arith.constant 0 : index
    %14 = vector.load %arg4[%c0_6, %c0_7] : memref<128x128xbf16, #tpu.memory_space<vmem>>, vector<128x128xbf16>
    %cst_8 = arith.constant dense<0.000000e+00> : vector<8x128xf32>
    %15 = tpu.matmul %13, %14, %cst_8 {dimension_numbers = #tpu.dot_dimension_numbers<[1], [1], [0], [0], [0, 0, 1, 0], [], []>} : vector<8x128xbf16>, vector<128x128xbf16>, vector<8x128xf32> -> vector<8x128xf32>
    %c0_9 = arith.constant 0 : index
    %c0_10 = arith.constant 0 : index
    %16 = vector.load %arg5[%c0_9, %c0_10] : memref<1x128xf32, #tpu.memory_space<vmem>>, vector<1x128xf32>
    %17 = vector.broadcast %16 : vector<1x128xf32> to vector<8x128xf32>
    %18 = arith.addf %15, %17 : vector<8x128xf32>
    %c0_11 = arith.constant 0 : index
    %c0_12 = arith.constant 0 : index
    %19 = vector.load %arg6[%c0_11, %c0_12] : memref<8x128xf32, #tpu.memory_space<vmem>>, vector<8x128xf32>
    tpu.vector_store %arg6[%c0_11, %c0_12], %18 {strides = array<i32>} : memref<8x128xf32, #tpu.memory_space<vmem>>, vector<8x128xf32>,
    return
  }
  func.func @transform_0(%arg0: i32) -> (i32, i32) {
    %c0_i32 = arith.constant 0 : i32
    %c0_i32_0 = arith.constant 0 : i32
    return %arg0, %c0_i32 : i32, i32
  }
  func.func @transform_1(%arg0: i32) -> (i32, i32) {
    %c0_i32 = arith.constant 0 : i32
    %c0_i32_0 = arith.constant 0 : i32
    %c0_i32_1 = arith.constant 0 : i32
    return %c0_i32, %c0_i32_0 : i32, i32
  }
  func.func @transform_2(%arg0: i32) -> (i32, i32) {
    %c0_i32 = arith.constant 0 : i32
    %c0_i32_0 = arith.constant 0 : i32
    %c0_i32_1 = arith.constant 0 : i32
    return %c0_i32, %c0_i32_0 : i32, i32
  }
  func.func @transform_3(%arg0: i32) -> (i32, i32) {
    %c0_i32 = arith.constant 0 : i32
    %c0_i32_0 = arith.constant 0 : i32
    %c0_i32_1 = arith.constant 0 : i32
    return %c0_i32, %c0_i32_0 : i32, i32
  }
  func.func @transform_4(%arg0: i32) -> (i32, i32) {
    %c0_i32 = arith.constant 0 : i32
    %c0_i32_0 = arith.constant 0 : i32
    %c0_i32_1 = arith.constant 0 : i32
    return %c0_i32, %c0_i32_0 : i32, i32
  }
  func.func @transform_5(%arg0: i32) -> (i32, i32) {
    %c0_i32 = arith.constant 0 : i32
    %c0_i32_0 = arith.constant 0 : i32
    return %arg0, %c0_i32 : i32, i32
  }
}

</mosaic_0001>

<bundles_post_ra>
// kernel: ffn_forward.1
= control target key start
LH: loop header
LB: loop body
LE: loop exit
PB: predicated region body
PF: predicated region fallthrough
CT: control target
= control target key end

     0   :  { %10 = vsyncpa [#allocation3], 0  ;;  %s926_s0 = inlined_call_operand.vmem [shape: f32[16,128], index: 0, kind: input, shape index: {}]   ;;  %s927_s1 = inlined_call_operand.vmem [shape: bf16[128,128], index: 1, kind: input, shape index: {}]   ;;  %s928_s2 = inlined_call_operand.vmem [shape: f32[1,128], index: 2, kind: input, shape index: {}]   ;;  %s929_s3 = inlined_call_operand.vmem [shape: bf16[128,128], index: 3, kind: input, shape index: {}]   ;;  %s930_s4 = inlined_call_operand.vmem [shape: f32[1,128], index: 4, kind: input, shape index: {}]   ;;  %s931_s5 = inlined_call_operand.hbm [shape: f32[16,128], index: 5, kind: output, shape index: {}]  }
   0x1   :  { %12 = vsyncpa [#allocation3 + $0x1], 0  ;;  %s772_s18 = smov 0   ;;  %s774_s19 = smov 0  }
   0x2   :  { %s776_s20 = smov 0   ;;  %s778_s21 = smov 0  }
   0x3 LB: > { %s793_s22 = sadd.s32 4294967295, %s737_s21   ;;  %s527_s23 = sadd.s32 4294967294, %s737_s21   ;;  %s737_s21 = sphi %s778_s21, %s937_s21   ;;  %s733_s20 = sphi %s776_s20, %s936_s20   ;;  %s729_s19 = sphi %s774_s19, %s935_s19   ;;  %s725_s18 = sphi %s772_s18, %s934_s18  }
   0x4   : > { %s797_s24 = sadd.s32 1, %s737_s21   ;;  %s135_s25 = sadd.s32 1, %s733_s20 }
   0x5   : > { %s132_s26 = ssub.s32 %s737_s21, %s797_s24  ;;  %p145_p0 = scmp.ne.s32.totalorder %s733_s20, %s729_s19 }
   0x6   : > { %p133_p1 = scmp.eq.s32.totalorder %s132_s26, 0  ;;  %p146_p2 = scmp.eq.s32.totalorder %s793_s22, 1 }
   0x7   : > { %p151_p3 = scmp.ne.s32.totalorder %s729_s19, %s725_s18  ;;  %p152_p4 = scmp.eq.s32.totalorder %s527_s23, 1 }
   0x8   : > { %s808_s27 = scalar_select %p133_p1, %s733_s20, %s135_s25  }
   0x9   : > { %p810_p5 = por %p146_p2, %p145_p0  ;;  %p814_p6 = por %p152_p4, %p151_p3 }
   0xa   : > { %p530_p7 = scmp.ge.s32.totalorder %s737_s21, 1  ;;  %p189_p8 = scmp.lt.s32.totalorder %s737_s21, 3 }
   0xc   : > { %p190_p9 = pnand %p530_p7, %p189_p8 }
   0xd   : > { %v655_v0 = vld [vmem:[%s927_s1] sm:$0xff] (!%p190_p9)   ;;  %v739_v1 = vmov (!%p190_p9), 0.0   ;;  %vm740_vm0 = vmmov (!%p190_p9), 0   ;;  %v656_v2 = vld [vmem:[%s927_s1 + $0x8] sm:$0xff] (!%p190_p9)   ;;  %v657_v4 = vld [vmem:[%s927_s1 + $0x10] sm:$0xff] (!%p190_p9)   ;;  %p216_p10 = scmp.lt.s32.totalorder (!%p190_p9), %s793_s22, 1 }
   0xe   : > { %193 = sbr.rel (%p190_p9) target bundleno = 550 (0x226), region = 40  ;;  %574 = vmatprep.subr.bf16.mxu0 (!%p190_p9), %v739_v1  ;;  %594 = vmatprep.subr.bf16.mxu1 (!%p190_p9), %v739_v1  ;;  %v663_v3 = vld [vmem:[%s929_s3] sm:$0xff] (!%p190_p9)   ;;  %v664_v5 = vld [vmem:[%s929_s3 + $0x8] sm:$0xff] (!%p190_p9)   ;;  %v658_v6 = vld [vmem:[%s927_s1 + $0x18] sm:$0xff] (!%p190_p9)   ;;  %s553_s16 = sshll.u32 (!%p190_p9), %s793_s22, 7 }
   0xf   : > { %575 = vmatpush3.bf16.xpose.msra.mxu0 (!%p190_p9), %v655_v0  ;;  %590 = vmatprep.mubr.msk.bf16.mxu0 (!%p190_p9), %vm740_vm0, %v739_v1  ;;  %v665_v7 = vld [vmem:[%s929_s3 + $0x10] sm:$0xff] (!%p190_p9)   ;;  %v659_v8 = vld [vmem:[%s927_s1 + $0x20] sm:$0xff] (!%p190_p9)   ;;  %v666_v9 = vld [vmem:[%s929_s3 + $0x18] sm:$0xff] (!%p190_p9)   ;;  %s884_s30 = scalar_lea.hbm (!%p190_p9), %s931_s5, %s553_s16  ;;  %s741_s7 = smov (!%p190_p9), [#allocation2]  }
  0x10   : > { %576 = vmatprep.subr.bf16.mxu0 (!%p190_p9), %v739_v1  ;;  %610 = vmatprep.mubr.msk.bf16.mxu1 (!%p190_p9), %vm740_vm0, %v739_v1  ;;  %v660_v10 = vld [vmem:[%s927_s1 + $0x28] sm:$0xff] (!%p190_p9)   ;;  %v661_v11 = vld [vmem:[%s927_s1 + $0x30] sm:$0xff] (!%p190_p9)   ;;  %v662_v12 = vld [vmem:[%s927_s1 + $0x38] sm:$0xff] (!%p190_p9)   ;;  %s679_s8 = sshll.u32 (!%p190_p9), %s741_s7, 4  ;;  %s680_s8 = int_to_ptr.vmem [resolvable:$false] %s679_s8 }
  0x11   : > { %595 = vmatpush3.bf16.xpose.msra.mxu1 (!%p190_p9), %v663_v3  ;;  %v667_v15 = vld [vmem:[%s929_s3 + $0x20] sm:$0xff] (!%p190_p9)   ;;  %v668_v16 = vld [vmem:[%s929_s3 + $0x28] sm:$0xff] (!%p190_p9)   ;;  %v669_v17 = vld [vmem:[%s929_s3 + $0x30] sm:$0xff] (!%p190_p9)   ;;  %s681_s9 = scalar_lea.vmem (!%p190_p9), %s680_s8, 256 }
  0x12   : > { %596 = vmatprep.subr.bf16.mxu1 (!%p190_p9), %v739_v1  ;;  %v670_v18 = vld [vmem:[%s929_s3 + $0x38] sm:$0xff] (!%p190_p9)   ;;  %v533_v19 = vld [vmem:[%s928_s2] ss:$0 sm:$0xff] (!%p190_p9) }
  0x13   : > { %v543_v31 = vld [vmem:[%s930_s4] ss:$0 sm:$0xff] (!%p190_p9) }
  0x15   : > { %s217_s11 = scalar_select %p216_p10, %s793_s22, 1 }
  0x17   : > { %577 = vmatpush3.bf16.xpose.msra.mxu0 %v656_v2  ;;  %s532_s12 = sshll.u32 %s217_s11, 3 }
  0x18   : > { %578 = vmatprep.subr.bf16.mxu0 %v739_v1  ;;  %s219_s17 = scalar_lea.vmem %s926_s0, %s532_s12  ;;  %s213_s12 = sand.u32 1, %s729_s19  }
  0x19   : > { %597 = vmatpush3.bf16.xpose.msra.mxu1 %v664_v5  ;;  %v221_v13 = vld [vmem:[%s219_s17] sm:$0xff]  ;;  %s531_s13 = sshll.u32 %s213_s12, 3  ;;  %s455_s6 = scalar_lea.sflag [#allocation3], %s213_s12 }
  0x1a   : > { %598 = vmatprep.subr.bf16.mxu1 %v739_v1  ;;  %v222_v14 = vpack.c.bf16 %v221_v13, %v221_v13  ;;  %s215_s17 = scalar_lea.vmem [#allocation2], %s531_s13 }
  0x1b   : > { %s468_s23 = sshll.u32 %s215_s17, 4  ;;  %s886_s23 = int_to_ptr.vmem [resolvable:$true] %s468_s23 }
  0x1c   : > { %s675_s22 = scalar_lea.vmem %s886_s23, 128  ;;  %p682_p0 = scmp.lt.s32.totalorder %s886_s23, %s680_s8 }
  0x1d   : > { %p676_p11 = scmp.ne.s32.totalorder %s886_s23, %s675_s22  ;;  %p683_p1 = scmp.lt.s32.totalorder %s681_s9, %s675_s22 }
  0x1f   : > { %579 = vmatpush3.bf16.xpose.msra.mxu0 %v657_v4  ;;  %p677_p12 = pnand %p676_p11, %p810_p5  ;;  %p684_p2 = por %p683_p1, %p682_p0 }
  0x20   : > { %580 = vmatprep.subr.bf16.mxu0 %v739_v1 }
  0x21   : > { %599 = vmatpush3.bf16.xpose.msra.mxu1 %v665_v7  ;;  %p678_p13 = pneg %p677_p12 }
  0x22   : > { %600 = vmatprep.subr.bf16.mxu1 %v739_v1 }
  0x23   : > { %p685_p3 = pnand %p684_p2, %p678_p13 }
  0x27   : > { %581 = vmatpush3.bf16.xpose.msra.mxu0 %v658_v6 }
  0x28   : > { %582 = vmatprep.subr.bf16.mxu0 %v739_v1 }
  0x29   : > { %601 = vmatpush3.bf16.xpose.msra.mxu1 %v666_v9 }
  0x2a   : > { %602 = vmatprep.subr.bf16.mxu1 %v739_v1 }
  0x2f   : > { %583 = vmatpush3.bf16.xpose.msra.mxu0 %v659_v8 }
  0x30   : > { %584 = vmatprep.subr.bf16.mxu0 %v739_v1 }
  0x31   : > { %603 = vmatpush3.bf16.xpose.msra.mxu1 %v667_v15 }
  0x32   : > { %604 = vmatprep.subr.bf16.mxu1 %v739_v1 }
  0x37   : > { %585 = vmatpush3.bf16.xpose.msra.mxu0 %v660_v10 }
  0x38   : > { %586 = vmatprep.subr.bf16.mxu0 %v739_v1 }
  0x39   : > { %605 = vmatpush3.bf16.xpose.msra.mxu1 %v668_v16 }
  0x3a   : > { %606 = vmatprep.subr.bf16.mxu1 %v739_v1 }
  0x3f   : > { %587 = vmatpush3.bf16.xpose.msra.mxu0 %v661_v11 }
  0x40   : > { %588 = vmatprep.subr.bf16.mxu0 %v739_v1 }
  0x41   : > { %607 = vmatpush3.bf16.xpose.msra.mxu1 %v669_v17 }
  0x42   : > { %608 = vmatprep.subr.bf16.mxu1 %v739_v1 }
  0x47   : > { %589 = vmatpush3.bf16.xpose.msra.mxu0 %v662_v12 }
  0x49   : > { %609 = vmatpush3.bf16.xpose.msra.mxu1 %v670_v18 }
  0x4e   : > { %591 = vmatmul.mubr.bf16.vlgmr.msra.gmra.mrb[0].mxu0 %v222_v14 }
 0x121   : > { %v328_v20 = vpop.f32.mrb[0].mxu0 }
 0x122   : > { %v329_v21 = vadd.f32 %v533_v19, %v328_v20  ;;  %v592_v22 = vpop.f32.mrb[1].mxu0 }
 0x123   : > { %v331_v23 = vpop.f32.mrb[2].mxu0 }
 0x124   : > { %v542_v24 = vmul.f32 -1.442695, %v329_v21  ;;  %v593_v25 = vpop.f32.mrb[3].mxu0 }
 0x126   : > { %671 = vpow2.f32 %v542_v24 }
 0x130   : > { %v672_v26 = vpop.eup %671 }
 0x131   : > { %v337_v27 = vadd.f32 1.0, %v672_v26 }
 0x133   : > { %673 = vrcp.f32 %v337_v27 }
 0x13d   : > { %v674_v28 = vpop.eup %673 }
 0x13e   : > { %v340_v29 = vmul.f32 %v674_v28, %v329_v21 }
 0x140   : > { %v341_v30 = vpack.c.bf16 %v340_v29, %v340_v29 }
 0x142   : > { %611 = vmatmul.mubr.bf16.vlgmr.msra.gmra.mrb[0].mxu1 %v341_v30 }
 0x215   : > { %v447_v32 = vpop.f32.mrb[0].mxu1 }
 0x216   : > { %v448_v33 = vadd.f32 %v543_v31, %v447_v32  ;;  %v612_v34 = vpop.f32.mrb[1].mxu1 }
 0x217   : > { %v450_v35 = vpop.f32.mrb[2].mxu1 }
 0x218   : > { %453 = vst [vmem:[%s215_s17] sm:$0xff] %v448_v33  ;;  %v613_v36 = vpop.f32.mrb[3].mxu1 }
 0x219   : > { %688 = shalt.err (!%p685_p3)
}
 0x21a   : > { %s689_s10 = scalar_lea.hbm %s884_s30, 128  ;;  %s693_s13 = scalar_lea.hbm %s931_s5, 256 }
 0x21b   : > { %p690_p4 = scmp.ne.s32.totalorder %s884_s30, %s689_s10  ;;  %p694_p9 = scmp.lt.u32.totalorder %s884_s30, %s931_s5 }
 0x21c   : > { %p695_p10 = scmp.lt.u32.totalorder %s693_s13, %s689_s10  ;;  %p697_p12 = scmp.lt.u32.totalorder %s689_s10, %s884_s30 }
 0x21d   : > { %p691_p7 = pnand %p690_p4, %p810_p5 }
 0x21e   : > { %p696_p11 = por %p695_p10, %p694_p9 }
 0x21f   : > { %p692_p8 = pneg %p691_p7 }
 0x220   : > { %p698_p13 = por %p697_p12, %p696_p11 }
 0x222   : > { %p699_p0 = pnand %p698_p13, %p692_p8 }
 0x224   : > { %702 = shalt.err (!%p699_p0)
}
 0x225   : > { %614 = dma.vmem_to_hbm [thread:$0]  (%p810_p5), %s886_s23, 128, %s884_s30, %s455_s6  }
 0x226 PF: > { %p620_p1 = scmp.ge.s32.totalorder %s737_s21, 2  ;;  %s480_s16 = sand.u32 1, %s725_s18  }
 0x227   : > { %s481_s17 = scalar_lea.sflag [#allocation3], %s480_s16 }
 0x228   : > { %p617_p2 = pnand %p620_p1, %p814_p6 }
 0x22a   : > { %720 = dma.done.wait (!%p617_p2), %s481_s17, 128  }
 0x22b   : > { %722 = vsyncadd (!%p617_p2), %s481_s17, 4294967168  ;;  %p15_p3 = scmp.ge.s32.totalorder %s797_s24, 4   ;;  %s934_s18 = smov %s729_s19 }
 0x22c   : > { %s935_s19 = smov %s733_s20  ;;  %s936_s20 = smov %s808_s27 }
 0x22d   : > { %s937_s21 = smov %s797_s24  ;;  %17 = sbr.rel (!%p15_p3) target bundleno = 3 (0x3), region = 75 }
 0x234   :  { %486 = vsyncpa [#allocation3], 1 }
 0x235   :  { %488 = vsyncpa [#allocation3 + $0x1], 1 }

</bundles_post_ra>
